<compile_context>
chip_gen: v5e
topology: v5e:2x2
jax: 0.10.0
libtpu: 0.0.40
codegen_flags: <defaults>
</compile_context>

<pallas_src>
import functools

import jax
import jax.numpy as jnp
from jax.experimental import pallas as pl
from jax.experimental.pallas import tpu as pltpu


def _gn1_fused(v, gamma, beta, eps):
    """GroupNorm(num_groups=1), single-pass, fused per-channel scale/shift.

    v: (C', HW) f32, gamma/beta: (C', 1).  Stats are over the whole sample.
    """
    inv_n = 1.0 / v.size
    mean = jnp.sum(v) * inv_n
    ex2 = jnp.sum(v * v) * inv_n
    var = jnp.maximum(ex2 - mean * mean, 0.0)       # guard tiny negative rounding
    rstd = jax.lax.rsqrt(var + eps)                 # EUP rsqrt (free slot)
    scale = gamma * rstd                            # (C', 1)
    shift = beta - mean * scale                     # (C', 1)
    return v * scale + shift                        # one mul + one add per element


def _lrelu(v, slope=0.2):
    # slope < 1  =>  LeakyReLU(x) == max(x, slope*x): single VPU max, no select.
    return jnp.maximum(v, slope * v)


def _inverted_res_block_kernel(
    x_ref,                        # (C, HW)   one sample, NCHW flattened
    idx_ref,                      # (2, HW)   int32: row 0 = H index, row 1 = W index
    w1_ref, g1_ref, b1_ref,       # (Cm, C), (Cm, 1), (Cm, 1)
    wd_ref, bd_ref,               # (Cm, 9), (Cm, 1)
    g2_ref, b2_ref,               # (Cm, 1), (Cm, 1)
    w3_ref, g3_ref, b3_ref,       # (Co, Cm), (Co, 1), (Co, 1)
    o_ref,                        # (Co, HW)
    *, H: int, W: int, use_res_connect: bool, eps: float,
):
    HW = x_ref.shape[1]

    def roll_lanes(v, delta):
        # s[..., f] = v[..., (f + delta) % HW]   (XLU lane rotation)
        return pltpu.roll(v, (-delta) % HW, axis=1)

    x = x_ref[...].astype(jnp.float32)                               # (C, HW)

    # ---- stage 1: 1x1 expand (MXU GEMM) -> GN -> LeakyReLU ------------------
    h = jnp.dot(w1_ref[...], x, preferred_element_type=jnp.float32)  # (Cm, HW)
    h = _lrelu(_gn1_fused(h, g1_ref[...], b1_ref[...], eps))

    # ---- boundary masks for reflect-pad(1), computed once per sample --------
    row = idx_ref[0:1, :]
    col = idx_ref[1:2, :]
    top, bot = row == 0, row == H - 1
    lft, rgt = col == 0, col == W - 1

    # ---- stage 2: 3x3 depthwise conv via lane rolls + border fixups ---------
    h_up_raw = roll_lanes(h, -W)                 # row i-1 (wrapping)
    h_dn_raw = roll_lanes(h, +W)                 # row i+1 (wrapping)
    up = jnp.where(top, h_dn_raw, h_up_raw)      # reflect: row -1 -> row 1
    dn = jnp.where(bot, h_up_raw, h_dn_raw)      # reflect: row H  -> row H-2

    wd = wd_ref[...]                             # (Cm, 9), tap k = 3*(di+1)+(dj+1)
    acc = None
    for a, rt in enumerate((up, h, dn)):         # di = -1, 0, +1
        t_l_raw = roll_lanes(rt, -1)             # col j-1 (wrapping)
        t_r_raw = roll_lanes(rt, +1)             # col j+1 (wrapping)
        lt = jnp.where(lft, t_r_raw, t_l_raw)    # reflect: col -1 -> col 1
        rg = jnp.where(rgt, t_l_raw, t_r_raw)    # reflect: col W  -> col W-2
        for b, tap in enumerate((lt, rt, rg)):   # dj = -1, 0, +1
            k = 3 * a + b
            term = tap * wd[:, k:k + 1]          # (Cm,1) lane-broadcast weight
            acc = term if acc is None else acc + term
    acc = acc + bd_ref[...]                      # depthwise bias (Cm,1)
    d = _lrelu(_gn1_fused(acc, g2_ref[...], b2_ref[...], eps))

    # ---- stage 3: 1x1 project (MXU GEMM) -> GN (no bias, no activation) -----
    p = jnp.dot(w3_ref[...], d, preferred_element_type=jnp.float32)  # (Co, HW)
    p = _gn1_fused(p, g3_ref[...], b3_ref[...], eps)

    # ---- stage 4: residual ---------------------------------------------------
    if use_res_connect:
        p = p + x

    o_ref[...] = p.astype(o_ref.dtype)


def inverted_res_block(x_nchw, params, *, eps=1e-5):
    """Fused InvertedResBlock forward.

    x_nchw: (N, C, H, W) float array (PyTorch layout, kept end-to-end).
    params: dict of kernel-layout weights (see `convert_torch_params`).
    """
    w1, g1, b1 = params["w1"], params["g1"], params["b1"]
    wd, bd = params["wd"], params["bd"]
    g2, b2 = params["g2"], params["b2"]
    w3, g3, b3 = params["w3"], params["g3"], params["b3"]

    N, C, H, W = x_nchw.shape
    HW = H * W
    Cm = w1.shape[0]
    Co = w3.shape[0]
    assert H >= 2 and W >= 2, "reflect-pad(1) needs H, W >= 2"
    use_res_connect = (C == Co)

    # Free reshape only (no transpose): spatial rides the lane axis.
    x = x_nchw.reshape(N, C, HW)

    # Precomputed (row, col) index map for the reflect-pad border fixups.
    rows = jnp.repeat(jnp.arange(H, dtype=jnp.int32), W)
    cols = jnp.tile(jnp.arange(W, dtype=jnp.int32), H)
    idx = jnp.stack([rows, cols], axis=0)                       # (2, HW)

    kernel = functools.partial(
        _inverted_res_block_kernel,
        H=H, W=W, use_res_connect=use_res_connect, eps=eps)

    def _const_spec(arr):
        zeros = (0,) * arr.ndim
        return pl.BlockSpec(arr.shape, lambda n, _z=zeros: _z)  # VMEM-resident

    weight_bytes = sum(int(p.size) * 4 for p in
                       (idx, w1, g1, b1, wd, bd, g2, b2, w3, g3, b3))
    flops = N * (2 * HW * (C * Cm + Cm * Co)        # two GEMMs
                 + 18 * HW * Cm                     # depthwise MACs
                 + 8 * HW * Cm + 6 * HW * Co)       # GN/LReLU elementwise
    cost = pl.CostEstimate(
        flops=int(flops),
        transcendentals=3 * N,                      # one rsqrt per GN per sample
        bytes_accessed=int(x.size * 4 + N * Co * HW * 4 + weight_bytes))

    out = pl.pallas_call(
        kernel,
        out_shape=jax.ShapeDtypeStruct((N, Co, HW), x_nchw.dtype),
        grid=(N,),
        in_specs=[
            pl.BlockSpec((None, C, HW), lambda n: (n, 0, 0)),
            _const_spec(idx),
            _const_spec(w1), _const_spec(g1), _const_spec(b1),
            _const_spec(wd), _const_spec(bd),
            _const_spec(g2), _const_spec(b2),
            _const_spec(w3), _const_spec(g3), _const_spec(b3),
        ],
        out_specs=pl.BlockSpec((None, Co, HW), lambda n: (n, 0, 0)),
        compiler_params=pltpu.CompilerParams(
            dimension_semantics=("parallel",),       # batch shards across TCs
            vmem_limit_bytes=48 * 1024 * 1024),      # explicit, safe on v5e/v6e/v7x
        cost_estimate=cost,
    )(x, idx, w1, g1, b1, wd, bd, g2, b2, w3, g3, b3)

    return out.reshape(N, Co, H, W)                  # still NCHW, free reshape


def convert_torch_params(w1_oihw, g1, b1, wd_oihw, bd, g2, b2, w3_oihw, g3, b3):
    """PyTorch-layout InvertedResBlock weights -> kernel layout (channels on sublanes)."""
    Cm, C = w1_oihw.shape[:2]
    Co = w3_oihw.shape[0]
    return dict(
        w1=w1_oihw.reshape(Cm, C),                     # (Cm, C)
        g1=g1.reshape(Cm, 1), b1=b1.reshape(Cm, 1),
        wd=wd_oihw.reshape(Cm, 9),                     # (Cm, 9): k = 3*(di+1)+(dj+1)
        bd=bd.reshape(Cm, 1),
        g2=g2.reshape(Cm, 1), b2=b2.reshape(Cm, 1),
        w3=w3_oihw.reshape(Co, Cm),                    # (Co, Cm)
        g3=g3.reshape(Co, 1), b3=b3.reshape(Co, 1),
    )


def _reference_nchw(x, params, eps=1e-5):
    """Pure-JAX reference of the PyTorch module (for correctness check)."""
    N, C, H, W = x.shape
    x = x.astype(jnp.float32)

    def gn(v, gamma, beta):
        mean = jnp.mean(v, axis=(1, 2, 3), keepdims=True)
        var = jnp.mean(jnp.square(v - mean), axis=(1, 2, 3), keepdims=True)
        g = gamma.reshape(1, -1, 1, 1)
        b = beta.reshape(1, -1, 1, 1)
        return (v - mean) * jax.lax.rsqrt(var + eps) * g + b

    def lrelu(v):
        return jnp.where(v > 0, v, 0.2 * v)

    h = jnp.einsum("mc,nchw->nmhw", params["w1"], x)
    h = lrelu(gn(h, params["g1"], params["b1"]))

    hp = jnp.pad(h, ((0, 0), (0, 0), (1, 1), (1, 1)), mode="reflect")
    wd = params["wd"].reshape(-1, 3, 3)
    d = jnp.zeros_like(h)
    for a in range(3):
        for b in range(3):
            d = d + hp[:, :, a:a + H, b:b + W] * wd[:, a, b].reshape(1, -1, 1, 1)
    d = d + params["bd"].reshape(1, -1, 1, 1)
    d = lrelu(gn(d, params["g2"], params["b2"]))

    p = jnp.einsum("om,nmhw->nohw", params["w3"], d)
    p = gn(p, params["g3"], params["b3"])
    if p.shape[1] == C:
        p = p + x
    return p


if __name__ == "__main__":
    key = jax.random.PRNGKey(0)
    N, C, H, W = 2, 4, 16, 16
    expansion_ratio = 2
    Cm = int(round(C * expansion_ratio))      # bottleneck channels
    Co = C                                    # out_ch == in_ch -> residual path

    keys = jax.random.split(key, 11)
    x = jax.random.normal(keys[0], (N, C, H, W), jnp.float32)

    # PyTorch-layout parameters (Conv2d OIHW weights, per-channel GN affine).
    w1_pt = 0.3 * jax.random.normal(keys[1], (Cm, C, 1, 1), jnp.float32)
    g1 = 1.0 + 0.1 * jax.random.normal(keys[2], (Cm,), jnp.float32)
    b1 = 0.1 * jax.random.normal(keys[3], (Cm,), jnp.float32)
    wd_pt = 0.3 * jax.random.normal(keys[4], (Cm, 1, 3, 3), jnp.float32)
    bd = 0.1 * jax.random.normal(keys[5], (Cm,), jnp.float32)
    g2 = 1.0 + 0.1 * jax.random.normal(keys[6], (Cm,), jnp.float32)
    b2 = 0.1 * jax.random.normal(keys[7], (Cm,), jnp.float32)
    w3_pt = 0.3 * jax.random.normal(keys[8], (Co, Cm, 1, 1), jnp.float32)
    g3 = 1.0 + 0.1 * jax.random.normal(keys[9], (Co,), jnp.float32)
    b3 = 0.1 * jax.random.normal(keys[10], (Co,), jnp.float32)

    params = convert_torch_params(w1_pt, g1, b1, wd_pt, bd, g2, b2, w3_pt, g3, b3)

    out = jax.block_until_ready(inverted_res_block(x, params))

    ref = jax.block_until_ready(_reference_nchw(x, params))
    max_err = float(jnp.max(jnp.abs(out - ref)))
    if not (out.shape == (N, Co, H, W) and max_err < 5e-2):
        raise AssertionError(
            f"mismatch vs reference: shape={out.shape}, max|err|={max_err}")
    print("KERNEL_OK")
</pallas_src>

<mosaic_0001>
module attributes {stable_mosaic.version = 11 : i64} {
  func.func @_inverted_res_block_kernel(%arg0: i32, %arg1: memref<1x4x256xf32, #tpu.memory_space<vmem>>, %arg2: memref<2x256xi32, #tpu.memory_space<vmem>>, %arg3: memref<8x4xf32, #tpu.memory_space<vmem>>, %arg4: memref<8x1xf32, #tpu.memory_space<vmem>>, %arg5: memref<8x1xf32, #tpu.memory_space<vmem>>, %arg6: memref<8x9xf32, #tpu.memory_space<vmem>>, %arg7: memref<8x1xf32, #tpu.memory_space<vmem>>, %arg8: memref<8x1xf32, #tpu.memory_space<vmem>>, %arg9: memref<8x1xf32, #tpu.memory_space<vmem>>, %arg10: memref<4x8xf32, #tpu.memory_space<vmem>>, %arg11: memref<4x1xf32, #tpu.memory_space<vmem>>, %arg12: memref<4x1xf32, #tpu.memory_space<vmem>>, %arg13: memref<1x4x256xf32, #tpu.memory_space<vmem>>) attributes {dimension_semantics = [#tpu.dimension_semantics<parallel>], iteration_bounds = array<i64: 2>, scalar_prefetch = 0 : i64, scratch_operands = 0 : i64, tpu.core_type = #tpu.core_type<tc>, window_params = [{transform_indices = @transform_0, window_bounds = array<i64: 1, 4, 256>}, {pipeline_mode = #tpu.pipeline_mode<synchronous>, transform_indices = @transform_1, window_bounds = array<i64: 2, 256>}, {pipeline_mode = #tpu.pipeline_mode<synchronous>, transform_indices = @transform_2, window_bounds = array<i64: 8, 4>}, {pipeline_mode = #tpu.pipeline_mode<synchronous>, transform_indices = @transform_3, window_bounds = array<i64: 8, 1>}, {pipeline_mode = #tpu.pipeline_mode<synchronous>, transform_indices = @transform_4, window_bounds = array<i64: 8, 1>}, {pipeline_mode = #tpu.pipeline_mode<synchronous>, transform_indices = @transform_5, window_bounds = array<i64: 8, 9>}, {pipeline_mode = #tpu.pipeline_mode<synchronous>, transform_indices = @transform_6, window_bounds = array<i64: 8, 1>}, {pipeline_mode = #tpu.pipeline_mode<synchronous>, transform_indices = @transform_7, window_bounds = array<i64: 8, 1>}, {pipeline_mode = #tpu.pipeline_mode<synchronous>, transform_indices = @transform_8, window_bounds = array<i64: 8, 1>}, {pipeline_mode = #tpu.pipeline_mode<synchronous>, transform_indices = @transform_9, window_bounds = array<i64: 4, 8>}, {pipeline_mode = #tpu.pipeline_mode<synchronous>, transform_indices = @transform_10, window_bounds = array<i64: 4, 1>}, {pipeline_mode = #tpu.pipeline_mode<synchronous>, transform_indices = @transform_11, window_bounds = array<i64: 4, 1>}, {transform_indices = @transform_12, window_bounds = array<i64: 1, 4, 256>}]} {
    %c0 = arith.constant 0 : index
    %c0_0 = arith.constant 0 : index
    %c0_1 = arith.constant 0 : index
    %0 = vector.load %arg1[%c0, %c0_0, %c0_1] : memref<1x4x256xf32, #tpu.memory_space<vmem>>, vector<1x4x256xf32>
    %1 = vector.shape_cast %0 : vector<1x4x256xf32> to vector<4x256xf32>
    %c0_2 = arith.constant 0 : index
    %c0_3 = arith.constant 0 : index
    %2 = vector.load %arg3[%c0_2, %c0_3] : memref<8x4xf32, #tpu.memory_space<vmem>>, vector<8x4xf32>
    %cst = arith.constant dense<0.000000e+00> : vector<8x256xf32>
    %3 = tpu.matmul %2, %1, %cst {dimension_numbers = #tpu.dot_dimension_numbers<[1], [0], [0], [1], [0, 0, 1, 1], [], []>} : vector<8x4xf32>, vector<4x256xf32>, vector<8x256xf32> -> vector<8x256xf32>
    %c0_4 = arith.constant 0 : index
    %c0_5 = arith.constant 0 : index
    %4 = vector.load %arg4[%c0_4, %c0_5] : memref<8x1xf32, #tpu.memory_space<vmem>>, vector<8x1xf32>
    %c0_6 = arith.constant 0 : index
    %c0_7 = arith.constant 0 : index
    %5 = vector.load %arg5[%c0_6, %c0_7] : memref<8x1xf32, #tpu.memory_space<vmem>>, vector<8x1xf32>
    %6 = vector.shape_cast %3 : vector<8x256xf32> to vector<1x8x256xf32>
    %cst_8 = arith.constant dense<0.000000e+00> : vector<1xf32>
    %7 = vector.multi_reduction <add>, %6, %cst_8 [1, 2] : vector<1x8x256xf32> to vector<1xf32>
    %8 = vector.shape_cast %7 : vector<1xf32> to vector<1x1x1xf32>
    %9 = vector.extract %8[0, 0, 0] : f32 from vector<1x1x1xf32>
    %cst_9 = arith.constant 4.8828125E-4 : f32
    %10 = arith.mulf %9, %cst_9 : f32
    %11 = arith.mulf %3, %3 : vector<8x256xf32>
    %12 = vector.shape_cast %11 : vector<8x256xf32> to vector<1x8x256xf32>
    %cst_10 = arith.constant dense<0.000000e+00> : vector<1xf32>
    %13 = vector.multi_reduction <add>, %12, %cst_10 [1, 2] : vector<1x8x256xf32> to vector<1xf32>
    %14 = vector.shape_cast %13 : vector<1xf32> to vector<1x1x1xf32>
    %15 = vector.extract %14[0, 0, 0] : f32 from vector<1x1x1xf32>
    %cst_11 = arith.constant 4.8828125E-4 : f32
    %16 = arith.mulf %15, %cst_11 : f32
    %17 = arith.mulf %10, %10 : f32
    %18 = arith.subf %16, %17 : f32
    %cst_12 = arith.constant 0.000000e+00 : f32
    %19 = arith.maximumf %18, %cst_12 : f32
    %cst_13 = arith.constant 9.99999974E-6 : f32
    %20 = arith.addf %19, %cst_13 : f32
    %21 = math.rsqrt %20 : f32
    %22 = vector.broadcast %21 : f32 to vector<8x1xf32>
    %23 = arith.mulf %4, %22 : vector<8x1xf32>
    %24 = vector.broadcast %10 : f32 to vector<8x1xf32>
    %25 = arith.mulf %24, %23 : vector<8x1xf32>
    %26 = arith.subf %5, %25 : vector<8x1xf32>
    %27 = vector.broadcast %23 : vector<8x1xf32> to vector<8x256xf32>
    %28 = arith.mulf %3, %27 : vector<8x256xf32>
    %29 = vector.broadcast %26 : vector<8x1xf32> to vector<8x256xf32>
    %30 = arith.addf %28, %29 : vector<8x256xf32>
    %cst_14 = arith.constant 2.000000e-01 : f32
    %31 = vector.broadcast %cst_14 : f32 to vector<8x256xf32>
    %32 = arith.mulf %31, %30 : vector<8x256xf32>
    %33 = arith.maximumf %30, %32 : vector<8x256xf32>
    %c0_15 = arith.constant 0 : index
    %c0_16 = arith.constant 0 : index
    %34 = vector.load %arg2[%c0_15, %c0_16] : memref<2x256xi32, #tpu.memory_space<vmem>>, vector<1x256xi32>
    %c1 = arith.constant 1 : index
    %c0_17 = arith.constant 0 : index
    %35 = vector.load %arg2[%c1, %c0_17] : memref<2x256xi32, #tpu.memory_space<vmem>>, vector<1x256xi32>
    %c0_i32 = arith.constant 0 : i32
    %36 = vector.broadcast %c0_i32 : i32 to vector<1x256xi32>
    %37 = arith.cmpi eq, %34, %36 : vector<1x256xi32>
    %c15_i32 = arith.constant 15 : i32
    %38 = vector.broadcast %c15_i32 : i32 to vector<1x256xi32>
    %39 = arith.cmpi eq, %34, %38 : vector<1x256xi32>
    %c0_i32_18 = arith.constant 0 : i32
    %40 = vector.broadcast %c0_i32_18 : i32 to vector<1x256xi32>
    %41 = arith.cmpi eq, %35, %40 : vector<1x256xi32>
    %c15_i32_19 = arith.constant 15 : i32
    %42 = vector.broadcast %c15_i32_19 : i32 to vector<1x256xi32>
    %43 = arith.cmpi eq, %35, %42 : vector<1x256xi32>
    %c16_i32 = arith.constant 16 : i32
    %44 = tpu.dynamic_rotate %33 by %c16_i32 dim 1 : vector<8x256xf32>, i32 -> vector<8x256xf32>
    %c240_i32 = arith.constant 240 : i32
    %45 = tpu.dynamic_rotate %33 by %c240_i32 dim 1 : vector<8x256xf32>, i32 -> vector<8x256xf32>
    %46 = vector.shape_cast %37 : vector<1x256xi1> to vector<1x256xi1>
    %47 = vector.broadcast %46 : vector<1x256xi1> to vector<8x256xi1>
    %48 = arith.select %47, %45, %44 : vector<8x256xi1>, vector<8x256xf32>
    %49 = vector.shape_cast %39 : vector<1x256xi1> to vector<1x256xi1>
    %50 = vector.broadcast %49 : vector<1x256xi1> to vector<8x256xi1>
    %51 = arith.select %50, %44, %45 : vector<8x256xi1>, vector<8x256xf32>
    %c0_20 = arith.constant 0 : index
    %c0_21 = arith.constant 0 : index
    %52 = vector.load %arg6[%c0_20, %c0_21] : memref<8x9xf32, #tpu.memory_space<vmem>>, vector<8x9xf32>
    %c1_i32 = arith.constant 1 : i32
    %53 = tpu.dynamic_rotate %48 by %c1_i32 dim 1 : vector<8x256xf32>, i32 -> vector<8x256xf32>
    %c255_i32 = arith.constant 255 : i32
    %54 = tpu.dynamic_rotate %48 by %c255_i32 dim 1 : vector<8x256xf32>, i32 -> vector<8x256xf32>
    %55 = vector.shape_cast %41 : vector<1x256xi1> to vector<1x256xi1>
    %56 = vector.broadcast %55 : vector<1x256xi1> to vector<8x256xi1>
    %57 = arith.select %56, %54, %53 : vector<8x256xi1>, vector<8x256xf32>
    %58 = vector.shape_cast %43 : vector<1x256xi1> to vector<1x256xi1>
    %59 = vector.broadcast %58 : vector<1x256xi1> to vector<8x256xi1>
    %60 = arith.select %59, %53, %54 : vector<8x256xi1>, vector<8x256xf32>
    %61 = vector.extract_strided_slice %52 {offsets = [0, 0], sizes = [8, 1], strides = [1, 1]} : vector<8x9xf32> to vector<8x1xf32>
    %62 = vector.broadcast %61 : vector<8x1xf32> to vector<8x256xf32>
    %63 = arith.mulf %57, %62 : vector<8x256xf32>
    %64 = vector.extract_strided_slice %52 {offsets = [0, 1], sizes = [8, 1], strides = [1, 1]} : vector<8x9xf32> to vector<8x1xf32>
    %65 = vector.broadcast %64 : vector<8x1xf32> to vector<8x256xf32>
    %66 = arith.mulf %48, %65 : vector<8x256xf32>
    %67 = arith.addf %63, %66 : vector<8x256xf32>
    %68 = vector.extract_strided_slice %52 {offsets = [0, 2], sizes = [8, 1], strides = [1, 1]} : vector<8x9xf32> to vector<8x1xf32>
    %69 = vector.broadcast %68 : vector<8x1xf32> to vector<8x256xf32>
    %70 = arith.mulf %60, %69 : vector<8x256xf32>
    %71 = arith.addf %67, %70 : vector<8x256xf32>
    %c1_i32_22 = arith.constant 1 : i32
    %72 = tpu.dynamic_rotate %33 by %c1_i32_22 dim 1 : vector<8x256xf32>, i32 -> vector<8x256xf32>
    %c255_i32_23 = arith.constant 255 : i32
    %73 = tpu.dynamic_rotate %33 by %c255_i32_23 dim 1 : vector<8x256xf32>, i32 -> vector<8x256xf32>
    %74 = vector.shape_cast %41 : vector<1x256xi1> to vector<1x256xi1>
    %75 = vector.broadcast %74 : vector<1x256xi1> to vector<8x256xi1>
    %76 = arith.select %75, %73, %72 : vector<8x256xi1>, vector<8x256xf32>
    %77 = vector.shape_cast %43 : vector<1x256xi1> to vector<1x256xi1>
    %78 = vector.broadcast %77 : vector<1x256xi1> to vector<8x256xi1>
    %79 = arith.select %78, %72, %73 : vector<8x256xi1>, vector<8x256xf32>
    %80 = vector.extract_strided_slice %52 {offsets = [0, 3], sizes = [8, 1], strides = [1, 1]} : vector<8x9xf32> to vector<8x1xf32>
    %81 = vector.broadcast %80 : vector<8x1xf32> to vector<8x256xf32>
    %82 = arith.mulf %76, %81 : vector<8x256xf32>
    %83 = arith.addf %71, %82 : vector<8x256xf32>
    %84 = vector.extract_strided_slice %52 {offsets = [0, 4], sizes = [8, 1], strides = [1, 1]} : vector<8x9xf32> to vector<8x1xf32>
    %85 = vector.broadcast %84 : vector<8x1xf32> to vector<8x256xf32>
    %86 = arith.mulf %33, %85 : vector<8x256xf32>
    %87 = arith.addf %83, %86 : vector<8x256xf32>
    %88 = vector.extract_strided_slice %52 {offsets = [0, 5], sizes = [8, 1], strides = [1, 1]} : vector<8x9xf32> to vector<8x1xf32>
    %89 = vector.broadcast %88 : vector<8x1xf32> to vector<8x256xf32>
    %90 = arith.mulf %79, %89 : vector<8x256xf32>
    %91 = arith.addf %87, %90 : vector<8x256xf32>
    %c1_i32_24 = arith.constant 1 : i32
    %92 = tpu.dynamic_rotate %51 by %c1_i32_24 dim 1 : vector<8x256xf32>, i32 -> vector<8x256xf32>
    %c255_i32_25 = arith.constant 255 : i32
    %93 = tpu.dynamic_rotate %51 by %c255_i32_25 dim 1 : vector<8x256xf32>, i32 -> vector<8x256xf32>
    %94 = vector.shape_cast %41 : vector<1x256xi1> to vector<1x256xi1>
    %95 = vector.broadcast %94 : vector<1x256xi1> to vector<8x256xi1>
    %96 = arith.select %95, %93, %92 : vector<8x256xi1>, vector<8x256xf32>
    %97 = vector.shape_cast %43 : vector<1x256xi1> to vector<1x256xi1>
    %98 = vector.broadcast %97 : vector<1x256xi1> to vector<8x256xi1>
    %99 = arith.select %98, %92, %93 : vector<8x256xi1>, vector<8x256xf32>
    %100 = vector.extract_strided_slice %52 {offsets = [0, 6], sizes = [8, 1], strides = [1, 1]} : vector<8x9xf32> to vector<8x1xf32>
    %101 = vector.broadcast %100 : vector<8x1xf32> to vector<8x256xf32>
    %102 = arith.mulf %96, %101 : vector<8x256xf32>
    %103 = arith.addf %91, %102 : vector<8x256xf32>
    %104 = vector.extract_strided_slice %52 {offsets = [0, 7], sizes = [8, 1], strides = [1, 1]} : vector<8x9xf32> to vector<8x1xf32>
    %105 = vector.broadcast %104 : vector<8x1xf32> to vector<8x256xf32>
    %106 = arith.mulf %51, %105 : vector<8x256xf32>
    %107 = arith.addf %103, %106 : vector<8x256xf32>
    %108 = vector.extract_strided_slice %52 {offsets = [0, 8], sizes = [8, 1], strides = [1, 1]} : vector<8x9xf32> to vector<8x1xf32>
    %109 = vector.broadcast %108 : vector<8x1xf32> to vector<8x256xf32>
    %110 = arith.mulf %99, %109 : vector<8x256xf32>
    %111 = arith.addf %107, %110 : vector<8x256xf32>
    %c0_26 = arith.constant 0 : index
    %c0_27 = arith.constant 0 : index
    %112 = vector.load %arg7[%c0_26, %c0_27] : memref<8x1xf32, #tpu.memory_space<vmem>>, vector<8x1xf32>
    %113 = vector.broadcast %112 : vector<8x1xf32> to vector<8x256xf32>
    %114 = arith.addf %111, %113 : vector<8x256xf32>
    %c0_28 = arith.constant 0 : index
    %c0_29 = arith.constant 0 : index
    %115 = vector.load %arg8[%c0_28, %c0_29] : memref<8x1xf32, #tpu.memory_space<vmem>>, vector<8x1xf32>
    %c0_30 = arith.constant 0 : index
    %c0_31 = arith.constant 0 : index
    %116 = vector.load %arg9[%c0_30, %c0_31] : memref<8x1xf32, #tpu.memory_space<vmem>>, vector<8x1xf32>
    %117 = vector.shape_cast %114 : vector<8x256xf32> to vector<1x8x256xf32>
    %cst_32 = arith.constant dense<0.000000e+00> : vector<1xf32>
    %118 = vector.multi_reduction <add>, %117, %cst_32 [1, 2] : vector<1x8x256xf32> to vector<1xf32>
    %119 = vector.shape_cast %118 : vector<1xf32> to vector<1x1x1xf32>
    %120 = vector.extract %119[0, 0, 0] : f32 from vector<1x1x1xf32>
    %cst_33 = arith.constant 4.8828125E-4 : f32
    %121 = arith.mulf %120, %cst_33 : f32
    %122 = arith.mulf %114, %114 : vector<8x256xf32>
    %123 = vector.shape_cast %122 : vector<8x256xf32> to vector<1x8x256xf32>
    %cst_34 = arith.constant dense<0.000000e+00> : vector<1xf32>
    %124 = vector.multi_reduction <add>, %123, %cst_34 [1, 2] : vector<1x8x256xf32> to vector<1xf32>
    %125 = vector.shape_cast %124 : vector<1xf32> to vector<1x1x1xf32>
    %126 = vector.extract %125[0, 0, 0] : f32 from vector<1x1x1xf32>
    %cst_35 = arith.constant 4.8828125E-4 : f32
    %127 = arith.mulf %126, %cst_35 : f32
    %128 = arith.mulf %121, %121 : f32
    %129 = arith.subf %127, %128 : f32
    %cst_36 = arith.constant 0.000000e+00 : f32
    %130 = arith.maximumf %129, %cst_36 : f32
    %cst_37 = arith.constant 9.99999974E-6 : f32
    %131 = arith.addf %130, %cst_37 : f32
    %132 = math.rsqrt %131 : f32
    %133 = vector.broadcast %132 : f32 to vector<8x1xf32>
    %134 = arith.mulf %115, %133 : vector<8x1xf32>
    %135 = vector.broadcast %121 : f32 to vector<8x1xf32>
    %136 = arith.mulf %135, %134 : vector<8x1xf32>
    %137 = arith.subf %116, %136 : vector<8x1xf32>
    %138 = vector.broadcast %134 : vector<8x1xf32> to vector<8x256xf32>
    %139 = arith.mulf %114, %138 : vector<8x256xf32>
    %140 = vector.broadcast %137 : vector<8x1xf32> to vector<8x256xf32>
    %141 = arith.addf %139, %140 : vector<8x256xf32>
    %cst_38 = arith.constant 2.000000e-01 : f32
    %142 = vector.broadcast %cst_38 : f32 to vector<8x256xf32>
    %143 = arith.mulf %142, %141 : vector<8x256xf32>
    %144 = arith.maximumf %141, %143 : vector<8x256xf32>
    %c0_39 = arith.constant 0 : index
    %c0_40 = arith.constant 0 : index
    %145 = vector.load %arg10[%c0_39, %c0_40] : memref<4x8xf32, #tpu.memory_space<vmem>>, vector<4x8xf32>
    %cst_41 = arith.constant dense<0.000000e+00> : vector<4x256xf32>
    %146 = tpu.matmul %145, %144, %cst_41 {dimension_numbers = #tpu.dot_dimension_numbers<[1], [0], [0], [1], [0, 0, 1, 1], [], []>} : vector<4x8xf32>, vector<8x256xf32>, vector<4x256xf32> -> vector<4x256xf32>
    %c0_42 = arith.constant 0 : index
    %c0_43 = arith.constant 0 : index
    %147 = vector.load %arg11[%c0_42, %c0_43] : memref<4x1xf32, #tpu.memory_space<vmem>>, vector<4x1xf32>
    %c0_44 = arith.constant 0 : index
    %c0_45 = arith.constant 0 : index
    %148 = vector.load %arg12[%c0_44, %c0_45] : memref<4x1xf32, #tpu.memory_space<vmem>>, vector<4x1xf32>
    %149 = vector.shape_cast %146 : vector<4x256xf32> to vector<1x4x256xf32>
    %cst_46 = arith.constant dense<0.000000e+00> : vector<1xf32>
    %150 = vector.multi_reduction <add>, %149, %cst_46 [1, 2] : vector<1x4x256xf32> to vector<1xf32>
    %151 = vector.shape_cast %150 : vector<1xf32> to vector<1x1x1xf32>
    %152 = vector.extract %151[0, 0, 0] : f32 from vector<1x1x1xf32>
    %cst_47 = arith.constant 9.765625E-4 : f32
    %153 = arith.mulf %152, %cst_47 : f32
    %154 = arith.mulf %146, %146 : vector<4x256xf32>
    %155 = vector.shape_cast %154 : vector<4x256xf32> to vector<1x4x256xf32>
    %cst_48 = arith.constant dense<0.000000e+00> : vector<1xf32>
    %156 = vector.multi_reduction <add>, %155, %cst_48 [1, 2] : vector<1x4x256xf32> to vector<1xf32>
    %157 = vector.shape_cast %156 : vector<1xf32> to vector<1x1x1xf32>
    %158 = vector.extract %157[0, 0, 0] : f32 from vector<1x1x1xf32>
    %cst_49 = arith.constant 9.765625E-4 : f32
    %159 = arith.mulf %158, %cst_49 : f32
    %160 = arith.mulf %153, %153 : f32
    %161 = arith.subf %159, %160 : f32
    %cst_50 = arith.constant 0.000000e+00 : f32
    %162 = arith.maximumf %161, %cst_50 : f32
    %cst_51 = arith.constant 9.99999974E-6 : f32
    %163 = arith.addf %162, %cst_51 : f32
    %164 = math.rsqrt %163 : f32
    %165 = vector.broadcast %164 : f32 to vector<4x1xf32>
    %166 = arith.mulf %147, %165 : vector<4x1xf32>
    %167 = vector.broadcast %153 : f32 to vector<4x1xf32>
    %168 = arith.mulf %167, %166 : vector<4x1xf32>
    %169 = arith.subf %148, %168 : vector<4x1xf32>
    %170 = vector.broadcast %166 : vector<4x1xf32> to vector<4x256xf32>
    %171 = arith.mulf %146, %170 : vector<4x256xf32>
    %172 = vector.broadcast %169 : vector<4x1xf32> to vector<4x256xf32>
    %173 = arith.addf %171, %172 : vector<4x256xf32>
    %174 = arith.addf %173, %1 : vector<4x256xf32>
    %c0_52 = arith.constant 0 : index
    %c0_53 = arith.constant 0 : index
    %c0_54 = arith.constant 0 : index
    %175 = vector.load %arg13[%c0_52, %c0_53, %c0_54] : memref<1x4x256xf32, #tpu.memory_space<vmem>>, vector<1x4x256xf32>
    %176 = vector.shape_cast %175 : vector<1x4x256xf32> to vector<4x256xf32>
    %177 = vector.shape_cast %174 : vector<4x256xf32> to vector<1x4x256xf32>
    tpu.vector_store %arg13[%c0_52, %c0_53, %c0_54], %177 {strides = array<i32>} : memref<1x4x256xf32, #tpu.memory_space<vmem>>, vector<1x4x256xf32>,
    return
  }
  func.func @transform_0(%arg0: i32) -> (i32, i32, i32) {
    %c0_i32 = arith.constant 0 : i32
    %c0_i32_0 = arith.constant 0 : i32
    %c0_i32_1 = arith.constant 0 : i32
    return %arg0, %c0_i32, %c0_i32_0 : i32, i32, i32
  }
  func.func @transform_1(%arg0: i32) -> (i32, i32) {
    %c0_i32 = arith.constant 0 : i32
    %c0_i32_0 = arith.constant 0 : i32
    %c0_i32_1 = arith.constant 0 : i32
    return %c0_i32, %c0_i32_0 : i32, i32
  }
  func.func @transform_2(%arg0: i32) -> (i32, i32) {
    %c0_i32 = arith.constant 0 : i32
    %c0_i32_0 = arith.constant 0 : i32
    %c0_i32_1 = arith.constant 0 : i32
    return %c0_i32, %c0_i32_0 : i32, i32
  }
  func.func @transform_3(%arg0: i32) -> (i32, i32) {
    %c0_i32 = arith.constant 0 : i32
    %c0_i32_0 = arith.constant 0 : i32
    %c0_i32_1 = arith.constant 0 : i32
    return %c0_i32, %c0_i32_0 : i32, i32
  }
  func.func @transform_4(%arg0: i32) -> (i32, i32) {
    %c0_i32 = arith.constant 0 : i32
    %c0_i32_0 = arith.constant 0 : i32
    %c0_i32_1 = arith.constant 0 : i32
    return %c0_i32, %c0_i32_0 : i32, i32
  }
  func.func @transform_5(%arg0: i32) -> (i32, i32) {
    %c0_i32 = arith.constant 0 : i32
    %c0_i32_0 = arith.constant 0 : i32
    %c0_i32_1 = arith.constant 0 : i32
    return %c0_i32, %c0_i32_0 : i32, i32
  }
  func.func @transform_6(%arg0: i32) -> (i32, i32) {
    %c0_i32 = arith.constant 0 : i32
    %c0_i32_0 = arith.constant 0 : i32
    %c0_i32_1 = arith.constant 0 : i32
    return %c0_i32, %c0_i32_0 : i32, i32
  }
  func.func @transform_7(%arg0: i32) -> (i32, i32) {
    %c0_i32 = arith.constant 0 : i32
    %c0_i32_0 = arith.constant 0 : i32
    %c0_i32_1 = arith.constant 0 : i32
    return %c0_i32, %c0_i32_0 : i32, i32
  }
  func.func @transform_8(%arg0: i32) -> (i32, i32) {
    %c0_i32 = arith.constant 0 : i32
    %c0_i32_0 = arith.constant 0 : i32
    %c0_i32_1 = arith.constant 0 : i32
    return %c0_i32, %c0_i32_0 : i32, i32
  }
  func.func @transform_9(%arg0: i32) -> (i32, i32) {
    %c0_i32 = arith.constant 0 : i32
    %c0_i32_0 = arith.constant 0 : i32
    %c0_i32_1 = arith.constant 0 : i32
    return %c0_i32, %c0_i32_0 : i32, i32
  }
  func.func @transform_10(%arg0: i32) -> (i32, i32) {
    %c0_i32 = arith.constant 0 : i32
    %c0_i32_0 = arith.constant 0 : i32
    %c0_i32_1 = arith.constant 0 : i32
    return %c0_i32, %c0_i32_0 : i32, i32
  }
  func.func @transform_11(%arg0: i32) -> (i32, i32) {
    %c0_i32 = arith.constant 0 : i32
    %c0_i32_0 = arith.constant 0 : i32
    %c0_i32_1 = arith.constant 0 : i32
    return %c0_i32, %c0_i32_0 : i32, i32
  }
  func.func @transform_12(%arg0: i32) -> (i32, i32, i32) {
    %c0_i32 = arith.constant 0 : i32
    %c0_i32_0 = arith.constant 0 : i32
    %c0_i32_1 = arith.constant 0 : i32
    return %arg0, %c0_i32, %c0_i32_0 : i32, i32, i32
  }
}

</mosaic_0001>

<bundles_post_ra>
// kernel: tpu_custom_call.1
= control target key start
LH: loop header
LB: loop body
LE: loop exit
PB: predicated region body
PF: predicated region fallthrough
CT: control target
= control target key end

     0   :  { %s1512_s0 = inlined_call_operand.vmem [shape: f32[2,4,256], index: 0, kind: input, shape index: {}]   ;;  %s1513_s1 = inlined_call_operand.vmem [shape: s32[2,256], index: 1, kind: input, shape index: {}]   ;;  %s1514_s2 = inlined_call_operand.vmem [shape: f32[8,4], index: 2, kind: input, shape index: {}]   ;;  %s1515_s3 = inlined_call_operand.vmem [shape: f32[8,1], index: 3, kind: input, shape index: {}]   ;;  %s1516_s4 = inlined_call_operand.vmem [shape: f32[8,1], index: 4, kind: input, shape index: {}]   ;;  %s1517_s5 = inlined_call_operand.vmem [shape: f32[8,9], index: 5, kind: input, shape index: {}]   ;;  %s1518_s6 = inlined_call_operand.vmem [shape: f32[8,1], index: 6, kind: input, shape index: {}]   ;;  %s1519_s7 = inlined_call_operand.vmem [shape: f32[8,1], index: 7, kind: input, shape index: {}]   ;;  %s1520_s8 = inlined_call_operand.vmem [shape: f32[8,1], index: 8, kind: input, shape index: {}]   ;;  %s1521_s9 = inlined_call_operand.vmem [shape: f32[4,8], index: 9, kind: input, shape index: {}]   ;;  %s1522_s10 = inlined_call_operand.vmem [shape: f32[4,1], index: 10, kind: input, shape index: {}]   ;;  %s1523_s11 = inlined_call_operand.vmem [shape: f32[4,1], index: 11, kind: input, shape index: {}]   ;;  %s1524_s12 = inlined_call_operand.hbm [shape: f32[2,4,256], index: 12, kind: output, shape index: {}]  }
   0x1   :  { %1525 = sst [smem:[#allocation5_spill]] %s1512_s0 }
   0x2   :  { %1526 = sst [smem:[#allocation6_spill]] %s1513_s1 }
   0x3   :  { %17 = vsyncpa [#allocation3], 0 }
   0x4   :  { %19 = vsyncpa [#allocation3 + $0x1], 0  ;;  %s1227_s21 = smov 0   ;;  %s1229_s22 = smov 0  }
   0x5   :  { %s1231_s23 = smov 0   ;;  %s1233_s24 = smov 0  }
   0x6 LB: > { %s1248_s25 = sadd.s32 4294967295, %s1146_s24   ;;  %s973_s26 = sadd.s32 4294967294, %s1146_s24   ;;  %s1146_s24 = sphi %s1233_s24, %s1542_s24   ;;  %s1142_s23 = sphi %s1231_s23, %s1541_s23   ;;  %s1138_s22 = sphi %s1229_s22, %s1540_s22   ;;  %s1134_s21 = sphi %s1227_s21, %s1539_s21  }
   0x7   : > { %s1252_s27 = sadd.s32 1, %s1146_s24   ;;  %s289_s28 = sadd.s32 1, %s1142_s23 }
   0x8   : > { %s286_s29 = ssub.s32 %s1146_s24, %s1252_s27  ;;  %p299_p0 = scmp.ne.s32.totalorder %s1142_s23, %s1138_s22 }
   0x9   : > { %p287_p1 = scmp.eq.s32.totalorder %s286_s29, 0  ;;  %p300_p2 = scmp.eq.s32.totalorder %s1248_s25, 1 }
   0xa   : > { %p305_p3 = scmp.ne.s32.totalorder %s1138_s22, %s1134_s21  ;;  %p306_p4 = scmp.eq.s32.totalorder %s973_s26, 1 }
   0xb   : > { %s1263_s30 = scalar_select %p287_p1, %s1142_s23, %s289_s28  }
   0xc   : > { %p1265_p5 = por %p300_p2, %p299_p0  ;;  %p1269_p6 = por %p306_p4, %p305_p3 }
   0xd   : > { %p976_p7 = scmp.ge.s32.totalorder %s1146_s24, 1  ;;  %p365_p8 = scmp.lt.s32.totalorder %s1146_s24, 3 }
   0xf   : > { %p366_p9 = pnand %p976_p7, %p365_p8 }
  0x10   : > { %p407_p10 = scmp.lt.s32.totalorder (!%p366_p9), %s1248_s25, 1  ;;  %s1529_s0 = sld [smem:[#allocation5_spill]] (!%p366_p9) }
  0x11   : > { %369 = sbr.rel (%p366_p9) target bundleno = 1747 (0x6d3), region = 68  ;;  %s1530_s1 = sld [smem:[#allocation6_spill]] (!%p366_p9) }
  0x16   : > { %s408_s15 = scalar_select %p407_p10, %s1248_s25, 1  ;;  %vm422_vm0 = vcmask 1043456   ;;  %v413_v1 = vld [vmem:[%s1514_s2] sm:$0xff]  ;;  %vm418_vm1 = vcmask 31744   ;;  %v1149_v32 = vmov 0   ;;  %v1150_v41 = vmov 2  }
  0x17   : > { %1065 = vset.pattern.permute.xlu1 %v1149_v32  ;;  %1066 = vset.pattern.permute.xlu2 %v1149_v32  ;;  %v467_v33 = vld [vmem:[%s1515_s3] sm:$0xff]  ;;  %v1151_v42 = vmov 1   ;;  %v1152_v43 = vmov 3   ;;  %v1156_v54 = vmov 5   ;;  %v1157_v55 = vmov 4  }
  0x18   : > { %s992_s16 = sshll.u32 %s408_s15, 3  ;;  %v468_v38 = vld [vmem:[%s1516_s4] sm:$0xff]  ;;  %1067 = vset.pattern.permute.xlu0 %v1151_v42  ;;  %v543_v58 = vlaneseq }
  0x19   : > { %s411_s19 = scalar_lea.vmem %s1529_s0, %s992_s16  ;;  %v1307_v40 = vld [vmem:[%s1517_s5] sm:$0xff] }
  0x1a   : > { %v412_v0 = vld [vmem:[%s411_s19] sm:$0xff]  ;;  %s1148_s19 = smov 0.0   ;;  %v1339_v61 = vand.u32 127, %v543_v58 }
  0x1b   : > { %415 = vst [vmem:[#allocation1] ss:$2 sm:$0xff] %v412_v0  ;;  %v532_v56 = vld [vmem:[%s1530_s1] ss:$2 sm:$0x3] }
  0x1c   : > { %vm535_vm5 = vcmp.eq.s32.totalorder %v532_v56, 0  ;;  %vm545_vm6 = vcmp.lt.s32.totalorder %v1339_v61, 16  ;;  %vm552_vm7 = vcmp.lt.s32.totalorder %v1339_v61, 112  ;;  %vm536_vm10 = vcmp.eq.s32.totalorder %v532_v56, 15 }
  0x1d   : > { %v555_v60 = vsel %vm535_vm5, 1, %v1149_v32  ;;  %vm581_vm15 = vcmp.lt.s32.totalorder %v1339_v61, 127 }
  0x1e   : > { %v557_v62 = vperm.slane %v555_v60, 1  ;;  %v556_v63 = vperm.slane %v555_v60, 0 }
  0x20   : > { %vm559_vm8 = vcmp.eq.s32.totalorder %v557_v62, 1  ;;  %vm558_vm9 = vcmp.eq.s32.totalorder %v556_v63, 1 }
  0x22   : > { %v416_v2 = vld.sshfl [vmem:[#allocation1] sm:$0xff pattern:$0x75316420]  ;;  %v417_v3 = vld.sshfl [vmem:[#allocation1 + $0x8] sm:$0xff pattern:$0x75316420] }
  0x23   : > { %980 = vmatpush.msk.msra.mxu0 %vm422_vm0, %v416_v2  ;;  %982 = vmatpush.msk.msra.mxu1 %vm422_vm0, %v417_v3  ;;  %884 = vst [vmem:[#allocation1] ss:$2 sm:$0xff] %v412_v0  ;;  %v1159_v0 = vmov 6  }
  0x24   : > { %981 = vmatmul.msk.f32.vlgmr.msra.gmra.mxu0 %vm418_vm1, %v413_v1  ;;  %983 = vmatmul.msk.f32.vlgmr.msra.gmra.mxu1 %vm418_vm1, %v413_v1  ;;  %v1160_v1 = vmov 7   ;;  %vm574_vm1 = vcmp.lt.s32.totalorder %v1339_v61, 1 }
  0xa1   : > { %v1285_v4 = vpop.f32.mrf.mxu0  ;;  %v1287_v5 = vpop.f32.mrf.mxu1 }
  0xa2   : > { %v469_v6 = vadd.f32 %v1287_v5, %v1285_v4  ;;  %v480_v7 = vmul.f32 %v1285_v4, %v1285_v4  ;;  %v481_v8 = vmul.f32 %v1287_v5, %v1287_v5 }
  0xa4   : > { %470 = vadd.xlane.f32.xlu0 %v469_v6  ;;  %v482_v9 = vadd.f32 %v481_v8, %v480_v7 }
  0xac   : > { %483 = vadd.xlane.f32.xlu0 %v482_v9 }
 0x117   : > { %v471_v10 = vpop.xlane.xlu0 %470 }
 0x118   : > { %v472_v11 = vrot.slane %v471_v10, 4 }
 0x11a   : > { %v473_v12 = vadd.f32 %v472_v11, %v471_v10  ;;  %v562_v11 = vsel %vm536_vm10, 1, %v1149_v32 }
 0x11c   : > { %v474_v13 = vrot.slane %v473_v12, 2 }
 0x11e   : > { %v475_v14 = vadd.f32 %v474_v13, %v473_v12  ;;  %v563_v12 = vperm.slane %v562_v11, 0  ;;  %v564_v13 = vperm.slane %v562_v11, 1 }
 0x11f   : > { %v484_v15 = vpop.xlane.xlu0 %483 }
 0x120   : > { %v485_v16 = vrot.slane %v484_v15, 4  ;;  %v476_v17 = vrot.slane %v475_v14, 1  ;;  %vm565_vm11 = vcmp.eq.s32.totalorder %v563_v12, 1  ;;  %vm566_vm12 = vcmp.eq.s32.totalorder %v564_v13, 1 }
 0x122   : > { %v486_v18 = vadd.f32 %v485_v16, %v484_v15  ;;  %v477_v19 = vadd.f32 %v476_v17, %v475_v14  ;;  %v1161_v14 = vmov 8   ;;  %v701_v17 = vld [vmem:[%s1518_s6] sm:$0xff] }
 0x124   : > { %v487_v20 = vrot.slane %v486_v18, 2  ;;  %994 = vpush %v477_v19 }
 0x126   : > { %v488_v21 = vadd.f32 %v487_v20, %v486_v18 }
 0x128   : > { %v489_v22 = vrot.slane %v488_v21, 1 }
 0x12a   : > { %v490_v23 = vadd.f32 %v489_v22, %v488_v21 }
 0x12c   : > { %996 = vpush %v490_v23 }
 0x155   : > { %s995_s28 = spop %994 }
 0x156   : > { %s479_s29 = smul.f32 0.00048828125, %s995_s28  ;;  %s1154_s28 = smov 16  }
 0x158   : > { %s493_s15 = smul.f32 %s479_s29, %s479_s29  ;;  %v511_v36 = vstv %s479_s29  ;;  %s1153_s29 = smov 112  }
 0x15d   : > { %s997_s16 = spop %996 }
 0x15e   : > { %s492_s17 = smul.f32 0.00048828125, %s997_s16 }
 0x160   : > { %s494_s18 = ssub.f32 %s492_s17, %s493_s15  ;;  %s1155_s15 = smov 1  }
 0x162   : > { %s495_s20 = smax.f32 %s1148_s19, %s494_s18 }
 0x163   : > { %s496_s26 = sadd.f32 1e-05, %s495_s20 }
 0x165   : > { %v497_v24 = vstv %s496_s26 }
 0x166   : > { %1078 = vrsqrt.f32 %v497_v24  ;;  %vm504_vm3 = vweird.f32 %v497_v24 }
 0x16c   : > { %v1079_v25 = vpop.eup %1078 }
 0x16d   : > { %v499_v26 = vmul.f32 %v1079_v25, %v497_v24  ;;  %vm505_vm2 = vweird.f32 %v1079_v25 }
 0x16e   : > { %vm506_vm4 = vmor %vm504_vm3, %vm505_vm2 }
 0x16f   : > { %v500_v27 = vmul.f32 %v1079_v25, %v499_v26 }
 0x171   : > { %v501_v28 = vmul.f32 0.5, %v500_v27 }
 0x173   : > { %v502_v29 = vsub.f32 1.5, %v501_v28 }
 0x175   : > { %v503_v30 = vmul.f32 %v1079_v25, %v502_v29 }
 0x177   : > { %v507_v31 = vsel %vm506_vm4, %v1079_v25, %v503_v30  ;;  %v984_v25 = vld [vmem:[%s1530_s1 + $0x1] ss:$2 sm:$0x3] }
 0x178   : > { %998 = vpush %v507_v31  ;;  %vm537_vm13 = vcmp.eq.s32.totalorder %v984_v25, 0  ;;  %vm538_vm14 = vcmp.eq.s32.totalorder %v984_v25, 15 }
 0x179   : > { %v584_v28 = vsel %vm537_vm13, 1, %v1149_v32  ;;  %v591_v29 = vsel %vm538_vm14, 1, %v1149_v32 }
 0x17a   : > { %v585_v31 = vperm.slane %v584_v28, 0 }
 0x17c   : > { %vm1376_vm2 = vcmp.eq.s32.totalorder %v585_v31, 1 }
 0x1a9   : > { %s999_s16 = spop %998 }
 0x1aa   : > { %v509_v34 = vstv %s999_s16  ;;  %s1158_s16 = smov 127  }
 0x1ab   : > { %v510_v35 = vmul.f32 %v509_v34, %v467_v33  ;;  %v586_v33 = vperm.slane %v584_v28, 1  ;;  %v592_v34 = vperm.slane %v591_v29, 0 }
 0x1ad   : > { %516 = vperm.xlu1 %1065, %v510_v35   ;;  %v512_v37 = vmul.f32 %v511_v36, %v510_v35  ;;  %v593_v35 = vperm.slane %v591_v29, 1  ;;  %vm1380_vm3 = vcmp.eq.s32.totalorder %v586_v33, 1  ;;  %vm1384_vm4 = vcmp.eq.s32.totalorder %v592_v34, 1 }
 0x1af   : > { %v513_v39 = vsub.f32 %v468_v38, %v512_v37  ;;  %vm1388_vm5 = vcmp.eq.s32.totalorder %v593_v35, 1 }
 0x1b5   : > { %523 = vperm.xlu1 %1065, %v513_v39  }
 0x1bd   : > { %1068 = vset.pattern.permute.xlu1 %v1150_v41 }
 0x1be   : > { %614 = vperm.xlu1 %1068, %v1307_v40  }
 0x1c6   : > { %1069 = vset.pattern.permute.xlu1 %v1152_v43 }
 0x21f   : > { %v517_v44 = vpop.permute.xlu1 %516 }
 0x220   : > { %v519_v45 = vmul.f32 %v517_v44, %v1285_v4  ;;  %v520_v46 = vmul.f32 %v517_v44, %v1287_v5 }
 0x227   : > { %v524_v47 = vpop.permute.xlu1 %523 }
 0x228   : > { %v526_v48 = vadd.f32 %v524_v47, %v519_v45  ;;  %v527_v49 = vadd.f32 %v524_v47, %v520_v46 }
 0x22a   : > { %v528_v50 = vmul.f32 0.2, %v526_v48  ;;  %v529_v51 = vmul.f32 0.2, %v527_v49 }
 0x22c   : > { %v1312_v52 = vmax.f32 %v526_v48, %v528_v50  ;;  %v1314_v53 = vmax.f32 %v527_v49, %v529_v51 }
 0x22e   : > { %550 = vrot.lane.b32.xlu1 %v1314_v53, %s1153_s29  ;;  %548 = vrot.lane.b32.xlu0 %v1312_v52, %s1153_s29 }
 0x22f   : > { %539 = vrot.lane.b32.xlu2 %v1312_v52, %s1154_s28 }
 0x230   : > { %v1336_v59 = vpop.permute.xlu1 %614 }
 0x236   : > { %638 = vperm.xlu1 %1069, %v1307_v40   ;;  %606 = vperm.xlu0 %1067, %v1307_v40  }
 0x237   : > { %541 = vrot.lane.b32.xlu2 %v1314_v53, %s1154_s28 }
 0x23e   : > { %623 = vrot.lane.b32.xlu1 %v1314_v53, %s1155_s15  ;;  %1071 = vset.pattern.permute.xlu0 %v1156_v54 }
 0x23f   : > { %600 = vperm.xlu2 %1066, %v1307_v40   ;;  %654 = vperm.xlu0 %1071, %v1307_v40  }
 0x240   : > { %1073 = vset.pattern.permute.xlu1 %v1160_v1 }
 0x247   : > { %1070 = vset.pattern.permute.xlu2 %v1157_v55  ;;  %629 = vrot.lane.b32.xlu0 %v1314_v53, %s1158_s16 }
 0x248   : > { %646 = vperm.xlu2 %1070, %v1307_v40   ;;  %1072 = vset.pattern.permute.xlu0 %v1159_v0 }
 0x24f   : > { %678 = vperm.xlu0 %1072, %v1307_v40  }
 0x250   : > { %621 = vrot.lane.b32.xlu2 %v1312_v52, %s1155_s15 }
 0x251   : > { %1074 = vset.pattern.permute.xlu2 %v1161_v14 }
 0x257   : > { %1076 = vset.pattern.permute.xlu0 %v1149_v32 }
 0x258   : > { %627 = vrot.lane.b32.xlu2 %v1312_v52, %s1158_s16 }
 0x289   : > { %v540_v57 = vpop.permute.xlu2 %539 }
 0x291   : > { %v542_v2 = vpop.permute.xlu2 %541 }
 0x292   : > { %v546_v5 = vsel %vm545_vm6, %v540_v57, %v542_v2  ;;  %v547_v6 = vsel %vm545_vm6, %v542_v2, %v540_v57 }
 0x299   : > { %v601_v18 = vpop.permute.xlu2 %600 }
 0x2a0   : > { %v549_v3 = vpop.permute.xlu0 %548  ;;  %v551_v4 = vpop.permute.xlu1 %550 }
 0x2a1   : > { %v553_v7 = vsel %vm552_vm7, %v549_v3, %v551_v4  ;;  %v554_v8 = vsel %vm552_vm7, %v551_v4, %v549_v3 }
 0x2a2   : > { %v561_v9 = vsel %vm559_vm8, %v554_v8, %v546_v5  ;;  %v560_v10 = vsel %vm558_vm9, %v553_v7, %v547_v6  ;;  %v1350_v15 = vsel %vm565_vm11, %v547_v6, %v553_v7  ;;  %v1352_v16 = vsel %vm566_vm12, %v546_v5, %v554_v8  ;;  %v647_v19 = vpop.permute.xlu2 %646 }
 0x2a3   : > { %572 = vrot.lane.b32.xlu1 %v561_v9, %s1155_s15  ;;  %570 = vrot.lane.b32.xlu2 %v560_v10, %s1155_s15  ;;  %v649_v12 = vmul.f32 %v647_v19, %v1312_v52  ;;  %v650_v13 = vmul.f32 %v647_v19, %v1314_v53  ;;  %vm775_vm9 = vcmask 64512  }
 0x2a8   : > { %v639_v21 = vpop.permute.xlu1 %638  ;;  %v607_v22 = vpop.permute.xlu0 %606 }
 0x2a9   : > { %v609_v41 = vmul.f32 %v607_v22, %v560_v10  ;;  %v610_v42 = vmul.f32 %v607_v22, %v561_v9 }
 0x2aa   : > { %v622_v20 = vpop.permute.xlu2 %621 }
 0x2ab   : > { %579 = vrot.lane.b32.xlu1 %v561_v9, %s1158_s16  ;;  %577 = vrot.lane.b32.xlu2 %v560_v10, %s1158_s16 }
 0x2b0   : > { %v624_v24 = vpop.permute.xlu1 %623 }
 0x2b1   : > { %v655_v27 = vpop.permute.xlu0 %654  ;;  %v625_v56 = vsel %vm574_vm1, %v622_v20, %v624_v24  ;;  %v626_v57 = vsel %vm574_vm1, %v624_v24, %v622_v20 }
 0x2b2   : > { %v628_v23 = vpop.permute.xlu2 %627 }
 0x2b3   : > { %661 = vrot.lane.b32.xlu1 %v1350_v15, %s1155_s15  ;;  %663 = vrot.lane.b32.xlu2 %v1352_v16, %s1155_s15 }
 0x2b9   : > { %v630_v37 = vpop.permute.xlu0 %629 }
 0x2ba   : > { %v631_v43 = vsel %vm581_vm15, %v628_v23, %v630_v37  ;;  %v632_v44 = vsel %vm581_vm15, %v630_v37, %v628_v23 }
 0x2bb   : > { %667 = vrot.lane.b32.xlu1 %v1350_v15, %s1158_s16  ;;  %669 = vrot.lane.b32.xlu2 %v1352_v16, %s1158_s16  ;;  %v633_v62 = vsel %vm1376_vm2, %v631_v43, %v626_v57  ;;  %v634_v63 = vsel %vm1380_vm3, %v632_v44, %v625_v56  ;;  %v635_v9 = vsel %vm1384_vm4, %v626_v57, %v631_v43 }
 0x2bc   : > { %v641_v5 = vmul.f32 %v639_v21, %v633_v62  ;;  %v642_v6 = vmul.f32 %v639_v21, %v634_v63  ;;  %v636_v10 = vsel %vm1388_vm5, %v625_v56, %v632_v44 }
 0x2c1   : > { %v679_v24 = vpop.permute.xlu0 %678 }
 0x2c3   : > { %686 = vperm.xlu1 %1073, %v1307_v40   ;;  %694 = vperm.xlu2 %1074, %v1307_v40  }
 0x2cb   : > { %1075 = vset.pattern.permute.xlu1 %v1149_v32  ;;  %1077 = vset.pattern.permute.xlu2 %v1149_v32 }
 0x2cc   : > { %704 = vperm.xlu1 %1075, %v701_v17  }
 0x2fd   : > { %v571_v26 = vpop.permute.xlu2 %570 }
 0x305   : > { %v578_v36 = vpop.permute.xlu2 %577 }
 0x30d   : > { %v664_v4 = vpop.permute.xlu2 %663 }
 0x315   : > { %v573_v30 = vpop.permute.xlu1 %572  ;;  %v670_v25 = vpop.permute.xlu2 %669 }
 0x316   : > { %v575_v46 = vsel %vm574_vm1, %v571_v26, %v573_v30  ;;  %v576_v47 = vsel %vm574_vm1, %v573_v30, %v571_v26 }
 0x31d   : > { %v580_v45 = vpop.permute.xlu1 %579  ;;  %v695_v35 = vpop.permute.xlu2 %694 }
 0x31e   : > { %v582_v48 = vsel %vm581_vm15, %v578_v36, %v580_v45  ;;  %v583_v49 = vsel %vm581_vm15, %v580_v45, %v578_v36 }
 0x31f   : > { %v589_v50 = vsel %vm1376_vm2, %v582_v48, %v576_v47  ;;  %v590_v51 = vsel %vm1380_vm3, %v583_v49, %v575_v46  ;;  %v596_v54 = vsel %vm1384_vm4, %v576_v47, %v582_v48  ;;  %v597_v55 = vsel %vm1388_vm5, %v575_v46, %v583_v49 }
 0x320   : > { %v603_v58 = vmul.f32 %v601_v18, %v589_v50  ;;  %v604_v60 = vmul.f32 %v601_v18, %v590_v51  ;;  %v617_v2 = vmul.f32 %v1336_v59, %v596_v54  ;;  %v618_v3 = vmul.f32 %v1336_v59, %v597_v55 }
 0x321   : > { %v657_v18 = vmul.f32 %v655_v27, %v635_v9  ;;  %v658_v59 = vmul.f32 %v655_v27, %v636_v10 }
 0x322   : > { %v611_v0 = vadd.f32 %v609_v41, %v603_v58  ;;  %v612_v1 = vadd.f32 %v610_v42, %v604_v60 }
 0x324   : > { %v619_v7 = vadd.f32 %v617_v2, %v611_v0  ;;  %v620_v8 = vadd.f32 %v618_v3, %v612_v1 }
 0x325   : > { %v662_v11 = vpop.permute.xlu1 %661 }
 0x326   : > { %v643_v14 = vadd.f32 %v641_v5, %v619_v7  ;;  %v644_v17 = vadd.f32 %v642_v6, %v620_v8  ;;  %v665_v28 = vsel %vm574_vm1, %v662_v11, %v664_v4  ;;  %v666_v29 = vsel %vm574_vm1, %v664_v4, %v662_v11 }
 0x328   : > { %v651_v20 = vadd.f32 %v649_v12, %v643_v14  ;;  %v652_v22 = vadd.f32 %v650_v13, %v644_v17  ;;  %v709_v12 = vld [vmem:[%s1519_s7] sm:$0xff] }
 0x32a   : > { %v659_v21 = vadd.f32 %v657_v18, %v651_v20  ;;  %v660_v23 = vadd.f32 %v658_v59, %v652_v22  ;;  %v710_v59 = vld [vmem:[%s1520_s8] sm:$0xff] }
 0x32d   : > { %v668_v26 = vpop.permute.xlu1 %667 }
 0x32e   : > { %v671_v52 = vsel %vm581_vm15, %v668_v26, %v670_v25  ;;  %v672_v53 = vsel %vm581_vm15, %v670_v25, %v668_v26 }
 0x32f   : > { %v673_v19 = vsel %vm1376_vm2, %v671_v52, %v666_v29  ;;  %v674_v27 = vsel %vm1380_vm3, %v672_v53, %v665_v28  ;;  %v675_v36 = vsel %vm1384_vm4, %v666_v29, %v671_v52  ;;  %v676_v37 = vsel %vm1388_vm5, %v665_v28, %v672_v53 }
 0x330   : > { %v681_v30 = vmul.f32 %v679_v24, %v673_v19  ;;  %v682_v31 = vmul.f32 %v679_v24, %v674_v27  ;;  %v697_v42 = vmul.f32 %v695_v35, %v675_v36  ;;  %v698_v43 = vmul.f32 %v695_v35, %v676_v37  ;;  %v774_v19 = vld [vmem:[%s1521_s9] sm:$0xf] }
 0x332   : > { %v683_v33 = vadd.f32 %v681_v30, %v659_v21  ;;  %v684_v34 = vadd.f32 %v682_v31, %v660_v23 }
 0x335   : > { %v687_v41 = vpop.permute.xlu1 %686 }
 0x336   : > { %v689_v61 = vmul.f32 %v687_v41, %v1350_v15  ;;  %v690_v38 = vmul.f32 %v687_v41, %v1352_v16 }
 0x338   : > { %v691_v39 = vadd.f32 %v689_v61, %v683_v33  ;;  %v692_v44 = vadd.f32 %v690_v38, %v684_v34 }
 0x33a   : > { %v699_v45 = vadd.f32 %v697_v42, %v691_v39  ;;  %v700_v46 = vadd.f32 %v698_v43, %v692_v44 }
 0x33e   : > { %v705_v47 = vpop.permute.xlu1 %704 }
 0x33f   : > { %v707_v48 = vadd.f32 %v705_v47, %v699_v45  ;;  %v708_v49 = vadd.f32 %v705_v47, %v700_v46 }
 0x341   : > { %v711_v50 = vadd.f32 %v708_v49, %v707_v48  ;;  %v722_v32 = vmul.f32 %v707_v48, %v707_v48  ;;  %v723_v51 = vmul.f32 %v708_v49, %v708_v49 }
 0x343   : > { %712 = vadd.xlane.f32.xlu2 %v711_v50  ;;  %v724_v40 = vadd.f32 %v723_v51, %v722_v32 }
 0x345   : > { %725 = vadd.xlane.f32.xlu0 %v724_v40 }
 0x3b6   : > { %v713_v54 = vpop.xlane.xlu2 %712 }
 0x3b7   : > { %v714_v55 = vrot.slane %v713_v54, 4 }
 0x3b8   : > { %v726_v15 = vpop.xlane.xlu0 %725 }
 0x3b9   : > { %v715_v56 = vadd.f32 %v714_v55, %v713_v54  ;;  %v727_v16 = vrot.slane %v726_v15, 4 }
 0x3bb   : > { %v716_v57 = vrot.slane %v715_v56, 2  ;;  %v728_v58 = vadd.f32 %v727_v16, %v726_v15 }
 0x3bd   : > { %v729_v60 = vrot.slane %v728_v58, 2  ;;  %v717_v62 = vadd.f32 %v716_v57, %v715_v56 }
 0x3bf   : > { %v718_v63 = vrot.slane %v717_v62, 1  ;;  %v730_v0 = vadd.f32 %v729_v60, %v728_v58 }
 0x3c1   : > { %v719_v1 = vadd.f32 %v718_v63, %v717_v62  ;;  %v731_v2 = vrot.slane %v730_v0, 1  ;;  %v819_v62 = vld [vmem:[%s1522_s10] sm:$0xf] }
 0x3c3   : > { %1000 = vpush %v719_v1  ;;  %v732_v3 = vadd.f32 %v731_v2, %v730_v0  ;;  %v820_v2 = vld [vmem:[%s1523_s11] sm:$0xf] }
 0x3c5   : > { %1002 = vpush %v732_v3 }
 0x3f4   : > { %s1001_s15 = spop %1000 }
 0x3f5   : > { %s721_s16 = smul.f32 0.00048828125, %s1001_s15 }
 0x3f6   : > { %s1003_s17 = spop %1002 }
 0x3f7   : > { %s735_s18 = smul.f32 %s721_s16, %s721_s16  ;;  %v753_v17 = vstv %s721_s16 }
 0x3f8   : > { %s734_s20 = smul.f32 0.00048828125, %s1003_s17 }
 0x3fa   : > { %s736_s26 = ssub.f32 %s734_s20, %s735_s18 }
 0x3fc   : > { %s737_s29 = smax.f32 %s1148_s19, %s736_s26 }
 0x3fd   : > { %s738_s28 = sadd.f32 1e-05, %s737_s29 }
 0x3ff   : > { %v739_v4 = vstv %s738_s28 }
 0x400   : > { %1080 = vrsqrt.f32 %v739_v4  ;;  %vm746_vm7 = vweird.f32 %v739_v4 }
 0x406   : > { %v1081_v5 = vpop.eup %1080 }
 0x407   : > { %v741_v6 = vmul.f32 %v1081_v5, %v739_v4  ;;  %vm747_vm6 = vweird.f32 %v1081_v5 }
 0x408   : > { %vm748_vm8 = vmor %vm746_vm7, %vm747_vm6 }
 0x409   : > { %v742_v7 = vmul.f32 %v1081_v5, %v741_v6 }
 0x40b   : > { %v743_v8 = vmul.f32 0.5, %v742_v7 }
 0x40d   : > { %v744_v9 = vsub.f32 1.5, %v743_v8 }
 0x40f   : > { %v745_v10 = vmul.f32 %v1081_v5, %v744_v9  ;;  %v886_v9 = vld.sshfl [vmem:[#allocation1 + $0x8] sm:$0xff pattern:$0x75316420] }
 0x411   : > { %v749_v11 = vsel %vm748_vm8, %v1081_v5, %v745_v10 }
 0x412   : > { %1004 = vpush %v749_v11 }
 0x443   : > { %s1005_s17 = spop %1004 }
 0x444   : > { %v751_v13 = vstv %s1005_s17 }
 0x445   : > { %v752_v14 = vmul.f32 %v751_v13, %v709_v12  ;;  %v885_v12 = vld.sshfl [vmem:[#allocation1] sm:$0xff pattern:$0x75316420] }
 0x447   : > { %758 = vperm.xlu1 %1075, %v752_v14   ;;  %v754_v18 = vmul.f32 %v753_v17, %v752_v14 }
 0x449   : > { %v755_v20 = vsub.f32 %v710_v59, %v754_v18 }
 0x44f   : > { %765 = vperm.xlu1 %1075, %v755_v20  }
 0x4b9   : > { %v759_v22 = vpop.permute.xlu1 %758 }
 0x4ba   : > { %v761_v21 = vmul.f32 %v759_v22, %v707_v48  ;;  %v762_v23 = vmul.f32 %v759_v22, %v708_v49 }
 0x4c1   : > { %v766_v24 = vpop.permute.xlu1 %765 }
 0x4c2   : > { %v768_v25 = vadd.f32 %v766_v24, %v761_v21  ;;  %v769_v26 = vadd.f32 %v766_v24, %v762_v23 }
 0x4c4   : > { %v770_v28 = vmul.f32 0.2, %v768_v25  ;;  %v771_v29 = vmul.f32 0.2, %v769_v26 }
 0x4c6   : > { %v772_v52 = vmax.f32 %v768_v25, %v770_v28  ;;  %v773_v53 = vmax.f32 %v769_v26, %v771_v29 }
 0x4c8   : > { %794 = vmatpush.msra.mxu2 %v772_v52  ;;  %814 = vmatpush.msra.mxu3 %v773_v53 }
 0x4c9   : > { %985 = vmatmul.msk.f32.vlgmr.msra.gmra.mxu2 %vm775_vm9, %v774_v19  ;;  %986 = vmatmul.msk.f32.vlgmr.msra.gmra.mxu3 %vm775_vm9, %v774_v19 }
 0x54c   : > { %v1456_v27 = vpop.f32.mrf.mxu2  ;;  %v1458_v30 = vpop.f32.mrf.mxu3 }
 0x54d   : > { %v821_v31 = vsel %vm422_vm0, %v1456_v27, 0.0  ;;  %v834_v33 = vmul.f32 %v1456_v27, %v1456_v27  ;;  %v822_v34 = vsel %vm422_vm0, %v1458_v30, 0.0  ;;  %v835_v35 = vmul.f32 %v1458_v30, %v1458_v30 }
 0x54e   : > { %v823_v36 = vadd.f32 %v822_v34, %v821_v31 }
 0x54f   : > { %v836_v37 = vsel %vm422_vm0, %v834_v33, 0.0  ;;  %v837_v41 = vsel %vm422_vm0, %v835_v35, 0.0 }
 0x550   : > { %824 = vadd.xlane.f32.xlu1 %v823_v36  ;;  %v838_v61 = vadd.f32 %v837_v41, %v836_v37 }
 0x552   : > { %839 = vadd.xlane.f32.xlu2 %v838_v61 }
 0x5c3   : > { %v825_v38 = vpop.xlane.xlu1 %824 }
 0x5c4   : > { %v826_v42 = vrot.slane %v825_v38, 4 }
 0x5c5   : > { %v840_v43 = vpop.xlane.xlu2 %839 }
 0x5c6   : > { %v827_v39 = vadd.f32 %v826_v42, %v825_v38  ;;  %v841_v44 = vrot.slane %v840_v43, 4 }
 0x5c8   : > { %v828_v45 = vrot.slane %v827_v39, 2  ;;  %v842_v46 = vadd.f32 %v841_v44, %v840_v43 }
 0x5ca   : > { %v829_v47 = vadd.f32 %v828_v45, %v827_v39  ;;  %v843_v48 = vrot.slane %v842_v46, 2 }
 0x5cc   : > { %v830_v49 = vrot.slane %v829_v47, 1  ;;  %v844_v50 = vadd.f32 %v843_v48, %v842_v46 }
 0x5ce   : > { %v831_v32 = vadd.f32 %v830_v49, %v829_v47  ;;  %v845_v51 = vrot.slane %v844_v50, 1 }
 0x5d0   : > { %1006 = vpush %v831_v32  ;;  %v846_v40 = vadd.f32 %v845_v51, %v844_v50 }
 0x5d2   : > { %1008 = vpush %v846_v40 }
 0x601   : > { %s1007_s16 = spop %1006 }
 0x602   : > { %s833_s29 = smul.f32 0.0009765625, %s1007_s16 }
 0x603   : > { %s1009_s28 = spop %1008 }
 0x604   : > { %s849_s15 = smul.f32 %s833_s29, %s833_s29  ;;  %v867_v1 = vstv %s833_s29 }
 0x605   : > { %s848_s17 = smul.f32 0.0009765625, %s1009_s28 }
 0x607   : > { %s850_s18 = ssub.f32 %s848_s17, %s849_s15  ;;  %s404_s17 = sand.u32 1, %s1138_s22  }
 0x609   : > { %s851_s20 = smax.f32 %s1148_s19, %s850_s18  ;;  %s977_s18 = sshll.u32 %s404_s17, 3 }
 0x60a   : > { %s852_s0 = sadd.f32 1e-05, %s851_s20  ;;  %s993_s20 = sshll.u32 %s1248_s25, 3 }
 0x60b   : > { %s909_s26 = scalar_lea.hbm %s1524_s12, %s993_s20  ;;  %s406_s16 = scalar_lea.vmem [#allocation2], %s977_s18 }
 0x60c   : > { %v853_v54 = vstv %s852_s0  ;;  %s913_s28 = sshll.u32 %s909_s26, 4  ;;  %s898_s25 = scalar_lea.sflag [#allocation3], %s404_s17  ;;  %s914_s28 = int_to_ptr.hbm [resolvable:$true] %s913_s28 }
 0x60d   : > { %1082 = vrsqrt.f32 %v853_v54  ;;  %vm860_vm11 = vweird.f32 %v853_v54  ;;  %s1098_s15 = sshra.s32 %s914_s28, 4  ;;  %s1104_s18 = scalar_lea.hbm %s1524_s12, 16  ;;  %s1099_s15 = int_to_ptr.hbm [resolvable:$true] %s1098_s15 }
 0x60e   : > { %s1100_s0 = scalar_lea.hbm %s1099_s15, 8  ;;  %p1105_p0 = scmp.lt.s32.totalorder %s1099_s15, %s1524_s12 }
 0x60f   : > { %p1101_p11 = scmp.ne.s32.totalorder %s1099_s15, %s1100_s0  ;;  %p1106_p1 = scmp.lt.s32.totalorder %s1104_s18, %s1100_s0 }
 0x611   : > { %p1102_p12 = pnand %p1101_p11, %p1265_p5  ;;  %p1107_p2 = por %p1106_p1, %p1105_p0 }
 0x613   : > { %v1083_v55 = vpop.eup %1082  ;;  %p1103_p13 = pneg %p1102_p12 }
 0x614   : > { %v855_v15 = vmul.f32 %v1083_v55, %v853_v54  ;;  %vm861_vm10 = vweird.f32 %v1083_v55 }
 0x615   : > { %vm862_vm12 = vmor %vm860_vm11, %vm861_vm10  ;;  %p1108_p3 = pnand %p1107_p2, %p1103_p13 }
 0x616   : > { %v856_v56 = vmul.f32 %v1083_v55, %v855_v15 }
 0x618   : > { %v857_v16 = vmul.f32 0.5, %v856_v56 }
 0x61a   : > { %v858_v57 = vsub.f32 1.5, %v857_v16 }
 0x61c   : > { %v859_v58 = vmul.f32 %v1083_v55, %v858_v57 }
 0x61e   : > { %v863_v60 = vsel %vm862_vm12, %v1083_v55, %v859_v58 }
 0x61f   : > { %1010 = vpush %v863_v60 }
 0x650   : > { %s1011_s19 = spop %1010 }
 0x651   : > { %v865_v63 = vstv %s1011_s19  ;;  %s911_s19 = sshll.u32 %s406_s16, 4  ;;  %s912_s19 = int_to_ptr.vmem [resolvable:$true] %s911_s19 }
 0x652   : > { %v866_v0 = vmul.f32 %v865_v63, %v819_v62 }
 0x654   : > { %v868_v3 = vmul.f32 %v867_v1, %v866_v0  ;;  %872 = vperm.xlu0 %1076, %v866_v0  }
 0x656   : > { %v869_v4 = vsub.f32 %v820_v2, %v868_v3 }
 0x658   : > { %879 = vperm.xlu2 %1077, %v869_v4  }
 0x6b2   : > { %v880_v8 = vpop.permute.xlu2 %879 }
 0x6c6   : > { %v873_v5 = vpop.permute.xlu0 %872 }
 0x6c7   : > { %v875_v6 = vmul.f32 %v873_v5, %v1456_v27  ;;  %v876_v7 = vmul.f32 %v873_v5, %v1458_v30 }
 0x6c9   : > { %v882_v10 = vadd.f32 %v880_v8, %v875_v6  ;;  %v883_v11 = vadd.f32 %v880_v8, %v876_v7 }
 0x6cb   : > { %v890_v13 = vadd.f32 %v886_v9, %v883_v11  ;;  %v889_v14 = vadd.f32 %v885_v12, %v882_v10 }
 0x6cd   : > { %v893_v17 = vrot.slane %v890_v13, 4 }
 0x6cf   : > { %v894_v18 = vsel %vm422_vm0, %v889_v14, %v893_v17 }
 0x6d0   : > { %896 = vst [vmem:[%s406_s16] sm:$0xff] %v894_v18 }
 0x6d1   : > { %1111 = shalt.err (!%p1108_p3)
}
 0x6d2   : > { %1012 = dma.vmem_to_hbm [thread:$0]  (%p1265_p5), %s912_s19, 128, %s914_s28, %s898_s25  }
 0x6d3 PF: > { %p1018_p4 = scmp.ge.s32.totalorder %s1146_s24, 2  ;;  %s925_s17 = sand.u32 1, %s1134_s21  }
 0x6d4   : > { %s926_s16 = scalar_lea.sflag [#allocation3], %s925_s17 }
 0x6d5   : > { %p1015_p7 = pnand %p1018_p4, %p1269_p6 }
 0x6d7   : > { %p1016_p8 = pneg %p1015_p7 }
 0x6d9   : > { %1129 = dma.done.wait (%p1016_p8), %s926_s16, 128  }
 0x6da   : > { %1131 = vsyncadd (%p1016_p8), %s926_s16, 4294967168  ;;  %p22_p9 = scmp.ge.s32.totalorder %s1252_s27, 4   ;;  %s1539_s21 = smov %s1138_s22 }
 0x6db   : > { %s1540_s22 = smov %s1142_s23  ;;  %s1541_s23 = smov %s1263_s30 }
 0x6dc   : > { %s1542_s24 = smov %s1252_s27  ;;  %24 = sbr.rel (!%p22_p9) target bundleno = 6 (0x6), region = 104 }
 0x6e1   :  { %932 = vsyncpa [#allocation3], 1 }
 0x6e2   :  { %934 = vsyncpa [#allocation3 + $0x1], 1 }

</bundles_post_ra>
